<compile_context>
chip_gen: v7x
topology: tpu7x:2x2x1
jax: 0.10.0
libtpu: 0.0.40
codegen_flags: <defaults>
</compile_context>

<pallas_src>
import jax
import jax.numpy as jnp
from jax.experimental import pallas as pl
from jax.experimental.pallas import tpu as pltpu


def _round_up(x, m):
    return ((x + m - 1) // m) * m


def _linear_kernel(x_ref, w_ref, b_ref, o_ref):
    # x_ref: (tm, H_in), w_ref: (H_in, tn), b_ref: (1, tn), o_ref: (tm, tn)
    acc = jnp.dot(x_ref[...], w_ref[...], preferred_element_type=jnp.float32)
    o_ref[...] = (acc + b_ref[...]).astype(o_ref.dtype)


def sequence_wise_linear(x, w, b, *, tm=512, tn=None):
    """SequenceWise(Linear): y[t, n, :] = x[t, n, :] @ w + b.

    x: (T, N, H_in)  ->  (T, N, H_out)
    w: (H_in, H_out)
    b: (H_out,)
    """
    T, N, H_in = x.shape
    H_out = w.shape[1]
    M = T * N

    # --- SequenceWise collapse: (T, N, H) -> (T*N, H) (free reshape) ---------
    x2d = x.reshape(M, H_in)
    w = w.astype(x.dtype)                            # matmul in a single dtype
    b2d = b.reshape(1, H_out).astype(jnp.float32)    # f32 epilogue (v5e-safe)

    itemsize = jnp.dtype(x.dtype).itemsize

    # Row tile: large and aligned to the sublane packing of the input dtype
    # (8 rows for 4-byte, 16 for bf16, 32 for 1-byte dtypes).  Clamp so tiny
    # problems get a single block instead of a huge padded one.
    row_align = max(8, 32 // max(1, itemsize))
    tm = max(row_align, _round_up(min(tm, M), row_align))

    # H_out tile: keep the whole weight resident (fetched once) unless it is
    # too big for a comfortably double-buffered VMEM footprint; only tile when
    # the tile can stay lane-dense (multiple of 128).
    w_bytes = H_in * H_out * itemsize
    if tn is None:
        if w_bytes > 8 * 1024 * 1024 and H_out % 128 == 0:
            tn = 256 if H_out % 256 == 0 else 128
        else:
            tn = H_out
    tn = min(tn, H_out)
    if tn != H_out and H_out % 128 != 0:
        tn = H_out  # ragged lane tiles only allowed as the full dimension

    # TODO(synk): tile H_in (reduction axis last in grid + f32 accumulator
    # scratch) if the wrapped Linear ever exceeds ~4K input features.

    n_i = pl.cdiv(M, tm)        # row tiles
    n_j = pl.cdiv(H_out, tn)    # output-feature tiles

    cost = pl.CostEstimate(
        flops=2 * M * H_in * H_out,
        transcendentals=0,
        bytes_accessed=(M * H_in + H_in * H_out + M * H_out) * itemsize
        + H_out * 4,
    )
    cparams = pltpu.CompilerParams(
        dimension_semantics=("parallel",) * (1 if n_j == 1 else 2),
        vmem_limit_bytes=64 * 1024 * 1024,
    )

    if n_j == 1:
        # Whole weight resident: 1-D grid over row tiles.  Weight/bias block
        # indices are constant, so they are DMA'd once and stay in VMEM.
        grid = (n_i,)
        x_map = lambda i: (i, 0)
        w_map = lambda i: (0, 0)
        b_map = lambda i: (0, 0)
        o_map = lambda i: (i, 0)
    else:
        # Choose iteration order so the operand that gets re-streamed is the
        # cheaper one:  row-major re-reads W n_i times, col-major re-reads X
        # n_j times.
        x_bytes = M * H_in * itemsize
        row_major = n_i * w_bytes <= n_j * x_bytes
        if row_major:            # i outer, j inner: x row tile stays resident
            grid = (n_i, n_j)
            x_map = lambda i, j: (i, 0)
            w_map = lambda i, j: (0, j)
            b_map = lambda i, j: (0, j)
            o_map = lambda i, j: (i, j)
        else:                    # j outer, i inner: weight tile stays resident
            grid = (n_j, n_i)
            x_map = lambda j, i: (i, 0)
            w_map = lambda j, i: (0, j)
            b_map = lambda j, i: (0, j)
            o_map = lambda j, i: (i, j)

    out2d = pl.pallas_call(
        _linear_kernel,
        out_shape=jax.ShapeDtypeStruct((M, H_out), x.dtype),
        grid_spec=pltpu.PrefetchScalarGridSpec(
            num_scalar_prefetch=0,
            grid=grid,
            in_specs=[
                pl.BlockSpec((tm, H_in), x_map),   # x row tile
                pl.BlockSpec((H_in, tn), w_map),   # weight tile
                pl.BlockSpec((1, tn), b_map),      # bias tile
            ],
            out_specs=pl.BlockSpec((tm, tn), o_map),
        ),
        compiler_params=cparams,
        cost_estimate=cost,
    )(x2d, w, b2d)

    # --- SequenceWise un-collapse: (T*N, H_out) -> (T, N, H_out) -------------
    return out2d.reshape(T, N, H_out)


def _reference(x, w, b):
    T, N, H_in = x.shape
    y = x.reshape(T * N, H_in).astype(jnp.float32) @ w.astype(jnp.float32) + b
    return y.reshape(T, N, w.shape[1]).astype(x.dtype)


if __name__ == "__main__":
    key = jax.random.PRNGKey(0)

    # --- Test 1: small shapes matching the module's forward (1-D grid path) --
    T, N, H_in, H_out = 8, 2, 32, 32
    kx, kw, kb, key = jax.random.split(key, 4)
    x = jax.random.normal(kx, (T, N, H_in), dtype=jnp.float32)
    w = jax.random.normal(kw, (H_in, H_out), dtype=jnp.float32) * 0.1
    b = jax.random.normal(kb, (H_out,), dtype=jnp.float32) * 0.1

    y = jax.block_until_ready(sequence_wise_linear(x, w, b))
    y_ref = _reference(x, w, b)
    assert y.shape == (T, N, H_out)
    assert jnp.allclose(y, y_ref, atol=1e-4, rtol=1e-4)

    # --- Test 2: ragged row blocks + H_out lane tiling (2-D grid path) -------
    T2, N2, H_in2, H_out2 = 25, 12, 64, 256     # M = 300 (not a tile multiple)
    kx, kw, kb, key = jax.random.split(key, 4)
    x2 = jax.random.normal(kx, (T2, N2, H_in2), dtype=jnp.float32)
    w2 = jax.random.normal(kw, (H_in2, H_out2), dtype=jnp.float32) * 0.05
    b2 = jax.random.normal(kb, (H_out2,), dtype=jnp.float32) * 0.1

    y2 = jax.block_until_ready(sequence_wise_linear(x2, w2, b2, tm=128, tn=128))
    y2_ref = _reference(x2, w2, b2)
    assert y2.shape == (T2, N2, H_out2)
    assert jnp.allclose(y2, y2_ref, atol=1e-3, rtol=1e-3)

    # --- Test 3: bf16 inputs (16-row sublane alignment, dtype cast epilogue) -
    T3, N3, H_in3, H_out3 = 10, 3, 128, 128
    kx, kw, kb, key = jax.random.split(key, 4)
    x3 = jax.random.normal(kx, (T3, N3, H_in3), dtype=jnp.bfloat16)
    w3 = (jax.random.normal(kw, (H_in3, H_out3), dtype=jnp.float32) * 0.05
          ).astype(jnp.bfloat16)
    b3 = jax.random.normal(kb, (H_out3,), dtype=jnp.float32) * 0.1

    y3 = jax.block_until_ready(sequence_wise_linear(x3, w3, b3))
    y3_ref = _reference(x3, w3, b3)
    assert y3.shape == (T3, N3, H_out3)
    assert jnp.allclose(y3.astype(jnp.float32), y3_ref.astype(jnp.float32),
                        atol=5e-2, rtol=5e-2)

    print("KERNEL_OK")
</pallas_src>

<mosaic_0001>
module attributes {stable_mosaic.version = 11 : i64} {
  func.func @_linear_kernel(%arg0: i32, %arg1: memref<16x32xf32, #tpu.memory_space<vmem>>, %arg2: memref<32x32xf32, #tpu.memory_space<vmem>>, %arg3: memref<1x32xf32, #tpu.memory_space<vmem>>, %arg4: memref<16x32xf32, #tpu.memory_space<vmem>>) attributes {dimension_semantics = [#tpu.dimension_semantics<parallel>], iteration_bounds = array<i64: 1>, scalar_prefetch = 0 : i64, scratch_operands = 0 : i64, tpu.core_type = #tpu.core_type<tc>, window_params = [{transform_indices = @transform_0, window_bounds = array<i64: 16, 32>}, {pipeline_mode = #tpu.pipeline_mode<synchronous>, transform_indices = @transform_1, window_bounds = array<i64: 32, 32>}, {pipeline_mode = #tpu.pipeline_mode<synchronous>, transform_indices = @transform_2, window_bounds = array<i64: 1, 32>}, {transform_indices = @transform_3, window_bounds = array<i64: 16, 32>}]} {
    %c0 = arith.constant 0 : index
    %c0_0 = arith.constant 0 : index
    %0 = vector.load %arg1[%c0, %c0_0] : memref<16x32xf32, #tpu.memory_space<vmem>>, vector<16x32xf32>
    %c0_1 = arith.constant 0 : index
    %c0_2 = arith.constant 0 : index
    %1 = vector.load %arg2[%c0_1, %c0_2] : memref<32x32xf32, #tpu.memory_space<vmem>>, vector<32x32xf32>
    %cst = arith.constant dense<0.000000e+00> : vector<16x32xf32>
    %2 = tpu.matmul %0, %1, %cst {dimension_numbers = #tpu.dot_dimension_numbers<[1], [0], [0], [1], [0, 0, 1, 1], [], []>} : vector<16x32xf32>, vector<32x32xf32>, vector<16x32xf32> -> vector<16x32xf32>
    %c0_3 = arith.constant 0 : index
    %c0_4 = arith.constant 0 : index
    %3 = vector.load %arg3[%c0_3, %c0_4] : memref<1x32xf32, #tpu.memory_space<vmem>>, vector<1x32xf32>
    %4 = vector.broadcast %3 : vector<1x32xf32> to vector<16x32xf32>
    %5 = arith.addf %2, %4 : vector<16x32xf32>
    %c0_5 = arith.constant 0 : index
    %c0_6 = arith.constant 0 : index
    %6 = vector.load %arg4[%c0_5, %c0_6] : memref<16x32xf32, #tpu.memory_space<vmem>>, vector<16x32xf32>
    tpu.vector_store %arg4[%c0_5, %c0_6], %5 {strides = array<i32>} : memref<16x32xf32, #tpu.memory_space<vmem>>, vector<16x32xf32>,
    return
  }
  func.func @transform_0(%arg0: i32) -> (i32, i32) {
    %c0_i32 = arith.constant 0 : i32
    %c0_i32_0 = arith.constant 0 : i32
    return %arg0, %c0_i32 : i32, i32
  }
  func.func @transform_1(%arg0: i32) -> (i32, i32) {
    %c0_i32 = arith.constant 0 : i32
    %c0_i32_0 = arith.constant 0 : i32
    %c0_i32_1 = arith.constant 0 : i32
    return %c0_i32, %c0_i32_0 : i32, i32
  }
  func.func @transform_2(%arg0: i32) -> (i32, i32) {
    %c0_i32 = arith.constant 0 : i32
    %c0_i32_0 = arith.constant 0 : i32
    %c0_i32_1 = arith.constant 0 : i32
    return %c0_i32, %c0_i32_0 : i32, i32
  }
  func.func @transform_3(%arg0: i32) -> (i32, i32) {
    %c0_i32 = arith.constant 0 : i32
    %c0_i32_0 = arith.constant 0 : i32
    return %arg0, %c0_i32 : i32, i32
  }
}

</mosaic_0001>

<bundles_post_ra>
// kernel: tpu_custom_call.1
= control target key start
LH: loop header
LB: loop body
LE: loop exit
PB: predicated region body
PF: predicated region fallthrough
CT: control target
= control target key end

     0   :  { %8 = vsyncpa [#allocation3], 0  ;;  %s391_s0 = inlined_call_operand.hbm [shape: f32[16,32], index: 0, kind: input, shape index: {}]   ;;  %s392_s1 = inlined_call_operand.hbm [shape: f32[32,32], index: 1, kind: input, shape index: {}]   ;;  %s393_s2 = inlined_call_operand.hbm [shape: f32[1,32], index: 2, kind: input, shape index: {}]   ;;  %s394_s3 = inlined_call_operand.hbm [shape: f32[16,32], index: 3, kind: output, shape index: {}]  }
   0x1   :  { %9 = vsyncpa [#allocation6], 0 }
   0x2   :  { %10 = vsyncpa [#allocation4], 0  ;;  %s297_s12 = smov [#allocation5]   ;;  %s298_s14 = smov [#allocation2]  }
   0x3   :  { %s28_s13 = sshll.u32 %s297_s12, 4  ;;  %s16_s15 = sshll.u32 %s298_s14, 4  ;;  %s29_s13 = int_to_ptr.vmem [resolvable:$true] %s28_s13  ;;  %s323_s15 = int_to_ptr.vmem [resolvable:$true] %s16_s15 }
   0x4   :  { %s203_s18 = scalar_lea.hbm %s392_s1, 512 }
   0x5   :  { %p204_p0 = scmp.ne.s32.totalorder %s392_s1, %s203_s18  ;;  %p207_p1 = scmp.lt.u32.totalorder %s203_s18, %s392_s1 }
   0x7   :  { %p209_p2 = pnand %p207_p1, %p204_p0 }
   0x9   :  { %212 = shalt.err (!%p209_p2)
}
   0xa   :  { %s213_s23 = scalar_lea.vmem %s29_s13, 512  ;;  %p218_p4 = scmp.lt.s32.totalorder %s29_s13, %s29_s13 }
   0xb   :  { %p214_p3 = scmp.ne.s32.totalorder %s29_s13, %s213_s23  ;;  %p219_p5 = scmp.lt.s32.totalorder %s213_s23, %s213_s23 }
   0xd   :  { %p220_p6 = por %p219_p5, %p218_p4 }
   0xf   :  { %p221_p7 = pnand %p220_p6, %p214_p3 }
  0x11   :  { %224 = shalt.err (!%p221_p7)
}
  0x12   :  { %s299_s24 = smov 128   ;;  %s300_s25 = smov 8  }
  0x13   :  { %34 = dma.hbm_to_vmem [thread:$0]  %s392_s1, 512, %s29_s13, [#allocation6], %s299_s24, %s299_s24, %s300_s25  }
  0x14   :  { %s225_s30 = scalar_lea.hbm %s391_s0, 256 }
  0x15   :  { %p226_p8 = scmp.ne.s32.totalorder %s391_s0, %s225_s30  ;;  %p229_p9 = scmp.lt.u32.totalorder %s225_s30, %s391_s0 }
  0x17   :  { %p231_p10 = pnand %p229_p9, %p226_p8 }
  0x19   :  { %234 = shalt.err (!%p231_p10)
}
  0x1a   :  { %s235_s8 = scalar_lea.vmem %s323_s15, 256  ;;  %p240_p12 = scmp.lt.s32.totalorder %s323_s15, %s323_s15 }
  0x1b   :  { %p236_p11 = scmp.ne.s32.totalorder %s323_s15, %s235_s8  ;;  %p241_p13 = scmp.lt.s32.totalorder %s235_s8, %s235_s8 }
  0x1d   :  { %p242_p0 = por %p241_p13, %p240_p12 }
  0x1f   :  { %p243_p1 = pnand %p242_p0, %p236_p11 }
  0x21   :  { %246 = shalt.err (!%p243_p1)
}
  0x22   :  { %22 = dma.hbm_to_vmem [thread:$0]  %s391_s0, 256, %s323_s15, [#allocation3], %s299_s24, %s299_s24, %s300_s25  }
  0x23   :  { %s301_s10 = smov [#allocation7]   ;;  %s247_s14 = scalar_lea.hbm %s393_s2, 16 }
  0x24   :  { %s41_s11 = sshll.u32 %s301_s10, 4  ;;  %p248_p2 = scmp.ne.s32.totalorder %s393_s2, %s247_s14  ;;  %s42_s11 = int_to_ptr.vmem [resolvable:$true] %s41_s11 }
  0x25   :  { %p251_p3 = scmp.lt.u32.totalorder %s247_s14, %s393_s2 }
  0x27   :  { %p253_p4 = pnand %p251_p3, %p248_p2 }
  0x29   :  { %256 = shalt.err (!%p253_p4)
}
  0x2a   :  { %s257_s20 = scalar_lea.vmem %s42_s11, 16  ;;  %s261_s0 = scalar_lea.vmem %s42_s11, 32 }
  0x2b   :  { %p258_p5 = scmp.ne.s32.totalorder %s42_s11, %s257_s20  ;;  %p262_p6 = scmp.lt.s32.totalorder %s42_s11, %s42_s11 }
  0x2c   :  { %p263_p7 = scmp.lt.s32.totalorder %s261_s0, %s257_s20 }
  0x2e   :  { %p264_p8 = por %p263_p7, %p262_p6 }
  0x30   :  { %p265_p9 = pnand %p264_p8, %p258_p5 }
  0x32   :  { %268 = shalt.err (!%p265_p9)
}
  0x33   :  { %44 = dma.hbm_to_vmem [thread:$0]  %s393_s2, 16, %s42_s11, [#allocation6]  }
  0x34   :  { %291 = dma.done.wait [#allocation3], 256  }
  0x35   :  { %292 = vsyncadd [#allocation3], 4294967040 }
  0x36   :  { %293 = dma.done.wait [#allocation6], 528  }
  0x37   :  { %294 = vsyncadd [#allocation6], 4294966768  ;;  %vm67_vm0 = vcmask 261120   ;;  %v56_v0 = vld [vmem:[#allocation5] sm:$0xff]  ;;  %v57_v1 = vld [vmem:[#allocation5 + $0x8] sm:$0xff]  ;;  %s302_s2 = smov [#allocation8]  }
  0x38   :  { %v58_v2 = vld [vmem:[#allocation5 + $0x10] sm:$0xff]  ;;  %v189_v3 = vpack.c.bf16 %v57_v1, %v56_v0  ;;  %v59_v4 = vld [vmem:[#allocation5 + $0x18] sm:$0xff]  ;;  %v169_v8 = vld [vmem:[#allocation7] ss:$0 sm:$0xff]  ;;  %s156_s22 = sshll.u32 %s302_s2, 4  ;;  %s157_s22 = int_to_ptr.vmem [resolvable:$true] %s156_s22 }
  0x39   :  { %v54_v5 = vld [vmem:[#allocation2] sm:$0xff]  ;;  %v193_v6 = vpack.c.bf16 %v59_v4, %v58_v2  ;;  %v55_v7 = vld [vmem:[#allocation2 + $0x8] sm:$0xff]  ;;  %s269_s23 = scalar_lea.vmem %s157_s22, 256  ;;  %p274_p11 = scmp.lt.s32.totalorder %s157_s22, %s157_s22 }
  0x3a   :  { %186 = vmatprep.mubr.msk.f32.mxu0 %vm67_vm0, %v54_v5  ;;  %190 = vmatprep.subr.bf16.mxu0 %v189_v3  ;;  %p270_p10 = scmp.ne.s32.totalorder %s157_s22, %s269_s23  ;;  %p275_p12 = scmp.lt.s32.totalorder %s269_s23, %s269_s23 }
  0x3b   :  { %192 = vmatpush3.bf16.msra.mxu0 %v189_v3 }
  0x3c   :  { %194 = vmatprep.subr.bf16.mxu0 %v193_v6  ;;  %p276_p13 = por %p275_p12, %p274_p11 }
  0x3e   :  { %p277_p0 = pnand %p276_p13, %p270_p10 }
  0x3f   :  { %196 = vmatpush3.bf16.msra.mxu0 %v193_v6 }
  0x42   :  { %187 = vmatmul.mubr.msk.f32.vlgmr.msra.gmra.mrb[0].mxu0 %vm67_vm0, %v55_v7 }
 0x115   :  { %v188_v9 = vpop.f32.mrb[0].mxu0 }
 0x116   :  { %v146_v10 = vadd.f32 %v188_v9, %v169_v8  ;;  %v140_v11 = vpop.f32.mrb[1].mxu0 }
 0x117   :  { %v141_v12 = vadd.f32 %v169_v8, %v140_v11 }
 0x118   :  { %150 = vst.msk [vmem:[#allocation8 + $0x8] sm:$0xff] %vm67_vm0, %v146_v10 }
 0x119   :  { %149 = vst.msk [vmem:[#allocation8] sm:$0xff] %vm67_vm0, %v141_v12 }
 0x11a   :  { %280 = shalt.err (!%p277_p0)
}
 0x11b   :  { %s281_s28 = scalar_lea.hbm %s394_s3, 256 }
 0x11c   :  { %p282_p1 = scmp.ne.s32.totalorder %s394_s3, %s281_s28  ;;  %p285_p2 = scmp.lt.u32.totalorder %s281_s28, %s394_s3 }
 0x11e   :  { %p287_p3 = pnand %p285_p2, %p282_p1 }
 0x120   :  { %290 = shalt.err (!%p287_p3)
}
 0x121   :  { %162 = dma.vmem_to_hbm [thread:$0]  %s157_s22, 256, %s394_s3, [#allocation4], %s299_s24, %s299_s24, %s300_s25  }
 0x122   :  { %295 = dma.done.wait [#allocation4], 256  }
 0x123   :  { %296 = vsyncadd [#allocation4], 4294967040 }
 0x124   :  { %166 = vsyncpa [#allocation3], 1 }
 0x125   :  { %167 = vsyncpa [#allocation6], 1 }
 0x126   :  { %168 = vsyncpa [#allocation4], 1 }

</bundles_post_ra>
